<compile_context>
chip_gen: v6e
topology: v6e:2x2x1
jax: 0.10.0
libtpu: 0.0.40
codegen_flags: <defaults>
</compile_context>

<pallas_src>
import math

import jax
import jax.numpy as jnp
from jax.experimental import pallas as pl
from jax.experimental.pallas import tpu as pltpu

_SQRT_2_OVER_PI = math.sqrt(2.0 / math.pi)
_C1 = _SQRT_2_OVER_PI * 0.044715  # folded constant: sqrt(2/pi) * 0.044715


def _gelu_kernel(x_ref, o_ref):
    # Compute in f32 regardless of storage dtype (v5e has no bf16 VPU/EUP);
    # one cast at load + one at store avoids repeated bf16 pack/unpack.
    x = x_ref[...].astype(jnp.float32)
    # 0.5 * x * (1 + tanh(sqrt(2/pi) * (x + 0.044715 * x^3))), constants folded.
    inner = x * (_SQRT_2_OVER_PI + _C1 * x * x)
    o_ref[...] = (0.5 * x * (1.0 + jnp.tanh(inner))).astype(o_ref.dtype)


def _round_down(v: int, m: int) -> int:
    return (v // m) * m


def _round_up(v: int, m: int) -> int:
    return ((v + m - 1) // m) * m


def _cdiv(a: int, b: int) -> int:
    return (a + b - 1) // b


def _pick_fallback_cols(n: int, max_cols: int = 8192) -> int:
    """Largest divisor of n <= max_cols, preferring x128, then x8 multiples."""
    best128 = best8 = best_any = 0
    limit = min(n, max_cols)
    for d in range(1, limit + 1):
        if n % d == 0:
            best_any = d
            if d % 8 == 0:
                best8 = d
                if d % 128 == 0:
                    best128 = d
    return best128 or best8 or best_any or 1


def gelu(x: jax.Array, *, target_block_bytes: int = 4 * 1024 * 1024) -> jax.Array:
    """Tanh-approx GELU (elementwise) via a Pallas TPU kernel."""
    orig_shape = x.shape
    n = x.size
    if n == 0:
        return x

    itemsize = jnp.dtype(x.dtype).itemsize
    sub = 8 * max(1, 4 // itemsize)  # sublane tile: f32 -> 8, bf16 -> 16

    # ---- choose a (rows, cols) slab ------------------------------------
    last = orig_shape[-1] if x.ndim >= 1 else 1
    if last % 128 == 0:
        # Layout-preserving: collapse leading dims only (trailing dim is
        # already lane-dense, so no HBM relayout on input or output reshape).
        cols = last
    else:
        # Repack: best divisor of n (prefers %128, then %8). Costs one
        # relayout but keeps stores unmasked / lane-dense.
        cols = _pick_fallback_cols(n)
    rows = n // cols

    padded = False
    if cols < 128 and n >= 32768:
        # Only a narrow slab is available; for large arrays a one-time pad to
        # a 1024-lane slab beats wasting >90% of store bandwidth.
        cols = 1024
        rows = _cdiv(n, cols)
        pad = rows * cols - n
        x2 = jnp.pad(x.reshape(-1), (0, pad)).reshape(rows, cols)
        padded = True
    else:
        x2 = x.reshape(rows, cols)

    # ---- column tile: cap block bytes even for huge trailing dims -------
    min_rows_in_block = max(1, min(rows, sub))
    tc_cap = max(128, _round_down(
        max(128, target_block_bytes // (min_rows_in_block * itemsize)), 128))
    if cols <= tc_cap:
        tc = cols
    else:
        tc = tc_cap
        d = tc_cap
        while d >= max(128, tc_cap // 2):       # prefer a tile dividing cols
            if cols % d == 0:
                tc = d
                break
            d -= 128

    # ---- row tile: bytes-budgeted, multiple of the sublane tile ---------
    max_block_rows = max(sub, target_block_bytes // max(1, tc * itemsize))
    if rows <= max_block_rows:
        tr = rows
    else:
        tr = max(sub, _round_down(max_block_rows, sub))
        d = tr
        while d >= max(sub, tr // 2):           # prefer a tile dividing rows
            if rows % d == 0:
                tr = d
                break
            d -= sub

    # ---- never collapse to a single-block grid when rows can be split ---
    # >=2 blocks restores DMA-in/compute/DMA-out overlap; >=4 lets v7x's two
    # TensorCores each pipeline two blocks.
    if _cdiv(rows, tr) * _cdiv(cols, tc) == 1 and rows >= 2 * sub:
        want = 4 if rows >= 4 * sub else 2
        tr = max(sub, _round_up(_cdiv(rows, want), sub))

    grid = (_cdiv(rows, tr), _cdiv(cols, tc))

    # Double-buffered footprint ~4 * block_bytes (2 in + 2 out); give headroom
    # but stay inside every generation's physical VMEM (64 MiB on v7x).
    block_bytes = tr * tc * itemsize
    vmem_limit = int(min(48 * 1024 * 1024,
                         max(32 * 1024 * 1024, 5 * block_bytes)))

    out = pl.pallas_call(
        _gelu_kernel,
        out_shape=jax.ShapeDtypeStruct(x2.shape, x2.dtype),
        grid_spec=pltpu.PrefetchScalarGridSpec(
            num_scalar_prefetch=0,
            grid=grid,
            in_specs=[pl.BlockSpec((tr, tc), lambda i, j: (i, j))],
            out_specs=pl.BlockSpec((tr, tc), lambda i, j: (i, j)),
        ),
        compiler_params=pltpu.CompilerParams(
            dimension_semantics=("parallel", "parallel"),
            vmem_limit_bytes=vmem_limit,
        ),
    )(x2)

    if padded:
        return out.reshape(-1)[:n].reshape(orig_shape)
    return out.reshape(orig_shape)


def _ref_gelu(x):
    c = math.sqrt(2.0 / math.pi)
    xf = x.astype(jnp.float32)
    return (0.5 * xf * (1.0 + jnp.tanh(c * (xf + 0.044715 * xf ** 3)))).astype(x.dtype)


if __name__ == "__main__":
    key = jax.random.PRNGKey(0)
    k1, k2, k3, k4, k5 = jax.random.split(key, 5)

    # Nominal activation-shaped input (batch=2, seq=8, hidden=32), f32.
    x1 = jax.random.normal(k1, (2, 8, 32), dtype=jnp.float32)
    y1 = gelu(x1)
    jax.block_until_ready(y1)
    assert y1.shape == x1.shape and y1.dtype == x1.dtype
    assert jnp.allclose(y1, _ref_gelu(x1), atol=1e-6, rtol=1e-6)

    # Trailing dim already a multiple of 128 -> layout-preserving path,
    # forced >=2 grid steps for pipelining / megacore.
    x2 = jax.random.normal(k2, (2, 8, 128), dtype=jnp.float32)
    y2 = gelu(x2)
    jax.block_until_ready(y2)
    assert jnp.allclose(y2, _ref_gelu(x2), atol=1e-6, rtol=1e-6)

    # Element count not divisible by 128 -> divisor-based fallback path.
    x3 = jax.random.normal(k3, (3, 5, 7), dtype=jnp.float32)
    y3 = gelu(x3)
    jax.block_until_ready(y3)
    assert jnp.allclose(y3, _ref_gelu(x3), atol=1e-6, rtol=1e-6)

    # Multi-tile 2-D grid with a row tile that evenly divides the rows.
    x4 = jax.random.normal(k4, (40, 33, 128), dtype=jnp.float32)
    y4 = gelu(x4, target_block_bytes=64 * 1024)
    jax.block_until_ready(y4)
    assert jnp.allclose(y4, _ref_gelu(x4), atol=1e-6, rtol=1e-6)

    # bfloat16 storage: kernel computes in f32 internally, casts once at store.
    x5 = jax.random.normal(k5, (2, 8, 32), dtype=jnp.bfloat16)
    y5 = gelu(x5)
    jax.block_until_ready(y5)
    assert y5.shape == x5.shape and y5.dtype == jnp.bfloat16
    assert jnp.allclose(
        y5.astype(jnp.float32), _ref_gelu(x5).astype(jnp.float32),
        atol=2e-2, rtol=2e-2,
    )

    print("KERNEL_OK")
</pallas_src>

<mosaic_0001>
module attributes {stable_mosaic.version = 11 : i64} {
  func.func @_gelu_kernel(%arg0: i32, %arg1: i32, %arg2: memref<1x512xf32, #tpu.memory_space<vmem>>, %arg3: memref<1x512xf32, #tpu.memory_space<vmem>>) attributes {dimension_semantics = [#tpu.dimension_semantics<parallel>, #tpu.dimension_semantics<parallel>], iteration_bounds = array<i64: 1, 1>, scalar_prefetch = 0 : i64, scratch_operands = 0 : i64, tpu.core_type = #tpu.core_type<tc>, window_params = [{transform_indices = @transform_0, window_bounds = array<i64: 1, 512>}, {transform_indices = @transform_1, window_bounds = array<i64: 1, 512>}]} {
    %c0 = arith.constant 0 : index
    %c0_0 = arith.constant 0 : index
    %0 = vector.load %arg2[%c0, %c0_0] : memref<1x512xf32, #tpu.memory_space<vmem>>, vector<1x512xf32>
    %cst = arith.constant 0.0356774069 : f32
    %1 = vector.broadcast %cst : f32 to vector<1x512xf32>
    %2 = arith.mulf %1, %0 : vector<1x512xf32>
    %3 = arith.mulf %2, %0 : vector<1x512xf32>
    %cst_1 = arith.constant 0.797884583 : f32
    %4 = vector.broadcast %cst_1 : f32 to vector<1x512xf32>
    %5 = arith.addf %4, %3 : vector<1x512xf32>
    %6 = arith.mulf %0, %5 : vector<1x512xf32>
    %cst_2 = arith.constant 5.000000e-01 : f32
    %7 = vector.broadcast %cst_2 : f32 to vector<1x512xf32>
    %8 = arith.mulf %7, %0 : vector<1x512xf32>
    %9 = math.tanh %6 : vector<1x512xf32>
    %cst_3 = arith.constant 1.000000e+00 : f32
    %10 = vector.broadcast %cst_3 : f32 to vector<1x512xf32>
    %11 = arith.addf %10, %9 : vector<1x512xf32>
    %12 = arith.mulf %8, %11 : vector<1x512xf32>
    %c0_4 = arith.constant 0 : index
    %c0_5 = arith.constant 0 : index
    %13 = vector.load %arg3[%c0_4, %c0_5] : memref<1x512xf32, #tpu.memory_space<vmem>>, vector<1x512xf32>
    tpu.vector_store %arg3[%c0_4, %c0_5], %12 {strides = array<i32>} : memref<1x512xf32, #tpu.memory_space<vmem>>, vector<1x512xf32>,
    return
  }
  func.func @transform_0(%arg0: i32, %arg1: i32) -> (i32, i32) {
    %c0_i32 = arith.constant 0 : i32
    return %arg0, %arg1 : i32, i32
  }
  func.func @transform_1(%arg0: i32, %arg1: i32) -> (i32, i32) {
    %c0_i32 = arith.constant 0 : i32
    return %arg0, %arg1 : i32, i32
  }
}

</mosaic_0001>

<bundles_post_ra>
// kernel: tpu_custom_call.1
= control target key start
LH: loop header
LB: loop body
LE: loop exit
PB: predicated region body
PF: predicated region fallthrough
CT: control target
= control target key end

     0   :  { %6 = vsyncpa [#allocation3], 0  ;;  %s116_s0 = inlined_call_operand.hbm [shape: f32[1,512], index: 0, kind: input, shape index: {}]   ;;  %s117_s1 = inlined_call_operand.hbm [shape: f32[1,512], index: 1, kind: output, shape index: {}]  }
   0x1   :  { %7 = vsyncpa [#allocation4], 0  ;;  %s98_s6 = smov [#allocation2]  }
   0x2   :  { %s14_s7 = sshll.u32 %s98_s6, 4  ;;  %s15_s7 = int_to_ptr.vmem [resolvable:$true] %s14_s7 }
   0x3   :  { %s62_s8 = scalar_lea.vmem %s15_s7, 64  ;;  %p67_p1 = scmp.lt.s32.totalorder %s15_s7, %s15_s7 }
   0x4   :  { %p63_p0 = scmp.ne.s32.totalorder %s15_s7, %s62_s8  ;;  %p68_p2 = scmp.lt.s32.totalorder %s62_s8, %s62_s8 }
   0x6   :  { %p69_p3 = por %p68_p2, %p67_p1 }
   0x8   :  { %p70_p4 = pnand %p69_p3, %p63_p0 }
   0xa   :  { %73 = shalt.err (!%p70_p4)
}
   0xb   :  { %17 = dma.hbm_to_vmem [thread:$0]  %s116_s0, 64, %s15_s7, [#allocation3]  }
   0xc   :  { %94 = dma.done.wait [#allocation3], 64  }
   0xd   :  { %95 = vsyncadd [#allocation3], 4294967232  ;;  %v21_v0 = vld [vmem:[#allocation2] sm:$0xf]  ;;  %v30_v5 = vlaneseq  ;;  %s99_s11 = smov [#allocation5]  }
   0xe   :  { %v22_v1 = vmul.f32 0.035677407, %v21_v0  ;;  %v26_v6 = vmul.f32 0.5, %v21_v0  ;;  %s41_s12 = sshll.u32 %s99_s11, 4  ;;  %s42_s12 = int_to_ptr.vmem [resolvable:$true] %s41_s12 }
   0xf   :  { %vm32_vm0 = vcmp.lt.s32.totalorder %v30_v5, 512  ;;  %s74_s13 = scalar_lea.vmem %s42_s12, 64  ;;  %p79_p6 = scmp.lt.s32.totalorder %s42_s12, %s42_s12 }
  0x10   :  { %v23_v2 = vmul.f32 %v22_v1, %v21_v0  ;;  %p75_p5 = scmp.ne.s32.totalorder %s42_s12, %s74_s13  ;;  %p80_p7 = scmp.lt.s32.totalorder %s74_s13, %s74_s13 }
  0x12   :  { %v24_v3 = vadd.f32 0.7978846, %v23_v2  ;;  %p81_p8 = por %p80_p7, %p79_p6 }
  0x14   :  { %v25_v4 = vmul.f32 %v24_v3, %v21_v0  ;;  %p82_p9 = pnand %p81_p8, %p75_p5 }
  0x16   :  { %52 = vtanh.f32 %v25_v4 }
  0x23   :  { %v53_v7 = vpop.eup %52 }
  0x24   :  { %v28_v8 = vadd.f32 1.0, %v53_v7 }
  0x26   :  { %v29_v9 = vmul.f32 %v28_v8, %v26_v6 }
  0x28   :  { %34 = vst.msk [vmem:[#allocation5] sm:$0xf] %vm32_vm0, %v29_v9 }
  0x29   :  { %85 = shalt.err (!%p82_p9)
}
  0x2a   :  { %44 = dma.vmem_to_hbm [thread:$0]  %s42_s12, 64, %s117_s1, [#allocation4]  }
  0x2b   :  { %96 = dma.done.wait [#allocation4], 64  }
  0x2c   :  { %97 = vsyncadd [#allocation4], 4294967232 }
  0x2d   :  { %48 = vsyncpa [#allocation3], 1 }
  0x2e   :  { %49 = vsyncpa [#allocation4], 1 }

</bundles_post_ra>
